<compile_context>
chip_gen: v7x
topology: tpu7x:2x2x1
jax: 0.10.0
libtpu: 0.0.40
codegen_flags: <defaults>
</compile_context>

<pallas_src>
import functools

import jax
import jax.numpy as jnp
from jax import lax
from jax.experimental import pallas as pl
from jax.experimental.pallas import tpu as pltpu

BN_EPS = 1e-5


def _round_up(x, m):
    return ((x + m - 1) // m) * m


def _vmem_limit_bytes():
    """Generation-aware scoped-VMEM limit (v5e/v6e: 128 MiB physical, v7x: 64 MiB)."""
    try:
        cap = getattr(pltpu.get_tpu_info(), "vmem_capacity_bytes", None)
        if cap:
            return int(min(cap * 3 // 4, 100 * 1024 * 1024))
    except Exception:
        pass
    return 48 * 1024 * 1024  # safe on every generation, incl. v7x (64 MiB)


def _pick_tile_rows(h, w, cin, cout_pad, itemsize):
    """Largest divisor of H whose tile (rows*W) is a multiple of 128 lanes (or
    the full image) and fits a per-tile VMEM working-set budget."""
    # Rough per-pixel cost: patch (itemsize*9*Cin) + f32 conv tile (4*Cout_pad)
    # + double-buffered output tile (2*4*Cout_pad).
    per_pix = itemsize * 9 * cin + 4 * cout_pad + 8 * cout_pad
    max_pix = max(128, min(8192, (8 * 1024 * 1024) // max(per_pix, 1)))
    best = None
    for th in range(1, h + 1):
        if h % th:
            continue
        pix = th * w
        if pix > max_pix:
            continue
        if pix % 128 == 0 or pix == h * w:
            best = th
    return best if best is not None else h


def _conv_tile(xp_ref, w_ref, tile_idx, *, tile_rows, width, cin, fold_taps):
    """Fused-im2col 3x3 conv for one tile of output rows.

    xp_ref: (H+2, W+2, Cin) padded NHWC image of one batch element (VMEM).
    w_ref:  (9*Cin, Cout_pad) weight matrix, tap-major (kh, kw) row blocks.
    Returns the pre-BN conv output for output rows
    [tile_idx*tile_rows, (tile_idx+1)*tile_rows), flattened to
    (tile_rows*width, Cout_pad), f32.
    """
    h0 = pl.multiple_of(tile_idx * tile_rows, tile_rows)
    tile_pix = tile_rows * width
    slices = []
    for kh in range(3):
        for kw in range(3):
            # Dynamic (outer-dim) slice on H, static slice on W; minor dim
            # (Cin) untouched.  The flatten below is layout-preserving when
            # W % 8 == 0 (sublane-aligned); otherwise it still lowers, slower.
            xs = xp_ref[pl.ds(h0 + kh, tile_rows), kw:kw + width, :]
            slices.append(xs.reshape(tile_pix, cin))

    if fold_taps:
        # Single contraction with K = 9*Cin: one MXU push/pop per tile.
        patch = jnp.concatenate(slices, axis=-1)              # [tile_pix, 9*Cin]
        return jnp.dot(patch, w_ref[...], preferred_element_type=jnp.float32)

    # Large-Cin fallback: per-tap accumulation (K=Cin already saturates MXU).
    cout_pad = w_ref.shape[-1]
    acc = jnp.zeros((tile_pix, cout_pad), jnp.float32)
    for k, xs in enumerate(slices):
        acc = acc + jnp.dot(xs, w_ref[k * cin:(k + 1) * cin, :],
                            preferred_element_type=jnp.float32)
    return acc


def _stats_kernel(xp_ref, w_ref, st_ref, *, tile_rows, width, cin, fold_taps):
    """Pass 1: per-tile conv -> (pixel sum, centered sum of squares).

    Fully parallel grid: each (batch, tile) writes its own [2, Cout_pad]
    stats block; Chan's formula combines them exactly in the wrapper.
    """
    j = pl.program_id(1)
    y = _conv_tile(xp_ref, w_ref, j, tile_rows=tile_rows, width=width,
                   cin=cin, fold_taps=fold_taps)
    inv_pix = 1.0 / (tile_rows * width)
    s = jnp.sum(y, axis=0, keepdims=True)                      # [1, Cout_pad]
    d = y - s * inv_pix                                        # centered in-tile
    m2 = jnp.sum(d * d, axis=0, keepdims=True)                 # [1, Cout_pad]
    st_ref[...] = jnp.concatenate([s, m2], axis=0)             # single store


def _apply_kernel(xp_ref, w_ref, scale_ref, shift_ref, o_ref, *, tile_rows,
                  width, cin, cout, fold_taps):
    """Pass 2: recompute conv tile, apply folded BN affine + ReLU, store the
    transposed [Cout, tile_pix] tile (lane-dense output layout)."""
    j = pl.program_id(1)
    y = _conv_tile(xp_ref, w_ref, j, tile_rows=tile_rows, width=width,
                   cin=cin, fold_taps=fold_taps)
    y = jnp.maximum(y * scale_ref[...] + shift_ref[...], 0.0)
    o_ref[...] = jnp.transpose(y[:, :cout], (1, 0))


def conv_bn_relu(x, weight, bias, gamma, beta, *, tile_rows=None, eps=BN_EPS,
                 use_bf16=False):
    """Forward of ConvBnLeakyBNRelu2d (conv3x3 pad=1 + training-mode BN + ReLU).

    x:      [N, Cin, H, W]  (NCHW, float32)
    weight: [Cout, Cin, 3, 3]
    bias, gamma, beta: [Cout]
    returns [N, Cout, H, W] float32
    """
    del bias  # Cancels exactly under training-mode batch norm (mean subtraction).

    n, cin, h, w = x.shape
    cout = weight.shape[0]
    cout_pad = _round_up(cout, 8)
    compute_dtype = jnp.bfloat16 if use_bf16 else jnp.float32
    itemsize = jnp.dtype(compute_dtype).itemsize

    if tile_rows is None:
        tile_rows = _pick_tile_rows(h, w, cin, cout_pad, itemsize)
    if h % tile_rows != 0:
        raise ValueError("tile_rows must divide H")
    tile_pix = tile_rows * w
    if tile_pix % 128 != 0 and tile_pix != h * w:
        raise ValueError("tile_rows*W must be a multiple of 128 (or the full image)")
    n_ht = h // tile_rows
    hp, wp = h + 2, w + 2
    fold_taps = cin <= 128  # fold 9 taps into one K=9*Cin matmul for small/medium Cin

    # NCHW -> padded NHWC (cast first so the layout pass and DMAs move half the
    # bytes when feeding the MXU bf16).  See TODO(synk) above about dropping
    # this extra HBM pass for very large activations.
    xp = jnp.pad(jnp.transpose(x.astype(compute_dtype), (0, 2, 3, 1)),
                 ((0, 0), (1, 1), (1, 1), (0, 0)))

    # [Cout, Cin, 3, 3] -> [(kh, kw, Cin), Cout_pad], tap-major row blocks.
    wmat = jnp.transpose(weight.astype(compute_dtype), (2, 3, 1, 0)).reshape(9 * cin, cout)
    if cout_pad != cout:
        wmat = jnp.pad(wmat, ((0, 0), (0, cout_pad - cout)))

    vmem_limit = _vmem_limit_bytes()
    xp_spec = pl.BlockSpec((None, hp, wp, cin), lambda i, j: (i, 0, 0, 0))
    w_spec = pl.BlockSpec((9 * cin, cout_pad), lambda i, j: (0, 0))

    flops = 2 * n * h * w * 9 * cin * cout_pad
    in_bytes = xp.size * xp.dtype.itemsize + wmat.size * wmat.dtype.itemsize

    # ---- pass 1: conv tiles -> per-tile (sum, centered M2) over pixels ----
    stats = pl.pallas_call(
        functools.partial(_stats_kernel, tile_rows=tile_rows, width=w,
                          cin=cin, fold_taps=fold_taps),
        out_shape=jax.ShapeDtypeStruct((n, n_ht, 2, cout_pad), jnp.float32),
        grid=(n, n_ht),
        in_specs=[xp_spec, w_spec],
        out_specs=pl.BlockSpec((None, None, 2, cout_pad),
                               lambda i, j: (i, j, 0, 0)),
        compiler_params=pltpu.CompilerParams(
            dimension_semantics=("parallel", "parallel"),
            vmem_limit_bytes=vmem_limit),
        cost_estimate=pl.CostEstimate(
            flops=flops, transcendentals=0,
            bytes_accessed=in_bytes + n * n_ht * 2 * cout_pad * 4),
    )(xp, wmat)

    # ---- combine per-tile stats (Chan's parallel variance) + fold BN ----
    count = jnp.float32(n * h * w)
    sums = stats[:, :, 0, :]                                   # [n, n_ht, Cout_pad]
    m2s = stats[:, :, 1, :]
    mean = jnp.sum(sums, axis=(0, 1)) / count
    tile_mean = sums / jnp.float32(tile_pix)
    var = (jnp.sum(m2s, axis=(0, 1)) +
           jnp.float32(tile_pix) * jnp.sum((tile_mean - mean) ** 2, axis=(0, 1))) / count
    var = jnp.maximum(var, 0.0)
    inv_std = lax.rsqrt(var + eps)
    gamma_p = jnp.pad(gamma.astype(jnp.float32), (0, cout_pad - cout))
    beta_p = jnp.pad(beta.astype(jnp.float32), (0, cout_pad - cout))
    scale = (gamma_p * inv_std).reshape(1, cout_pad)
    shift = (beta_p - mean * gamma_p * inv_std).reshape(1, cout_pad)

    # ---- pass 2: recompute conv, apply BN affine + ReLU, lane-dense store ----
    out_flat = pl.pallas_call(
        functools.partial(_apply_kernel, tile_rows=tile_rows, width=w,
                          cin=cin, cout=cout, fold_taps=fold_taps),
        out_shape=jax.ShapeDtypeStruct((n, cout, h * w), jnp.float32),
        grid=(n, n_ht),
        in_specs=[xp_spec, w_spec,
                  pl.BlockSpec((1, cout_pad), lambda i, j: (0, 0)),
                  pl.BlockSpec((1, cout_pad), lambda i, j: (0, 0))],
        out_specs=pl.BlockSpec((None, cout, tile_pix), lambda i, j: (i, 0, j)),
        compiler_params=pltpu.CompilerParams(
            dimension_semantics=("parallel", "parallel"),
            vmem_limit_bytes=vmem_limit),
        cost_estimate=pl.CostEstimate(
            flops=flops, transcendentals=0,
            bytes_accessed=in_bytes + n * cout * h * w * 4),
    )(xp, wmat, scale, shift)

    # [N, Cout, H*W] -> [N, Cout, H, W]: free reshape, no transpose/slice pass.
    return out_flat.reshape(n, cout, h, w)


def reference(x, weight, bias, gamma, beta):
    """Plain-JAX reference (conv + bias + training-mode BN + ReLU)."""
    y = lax.conv_general_dilated(
        x, weight, window_strides=(1, 1), padding=((1, 1), (1, 1)),
        dimension_numbers=("NCHW", "OIHW", "NCHW"))
    y = y + bias.reshape(1, -1, 1, 1)
    mean = jnp.mean(y, axis=(0, 2, 3), keepdims=True)
    var = jnp.mean((y - mean) ** 2, axis=(0, 2, 3), keepdims=True)
    y_hat = (y - mean) * lax.rsqrt(var + BN_EPS)
    out = y_hat * gamma.reshape(1, -1, 1, 1) + beta.reshape(1, -1, 1, 1)
    return jnp.maximum(out, 0.0)


if __name__ == "__main__":
    key = jax.random.PRNGKey(0)
    k_x, k_w, k_b, k_g, k_beta = jax.random.split(key, 5)

    N, CIN, COUT, H, W = 2, 4, 8, 16, 16

    x = jax.random.normal(k_x, (N, CIN, H, W), dtype=jnp.float32)
    weight = jax.random.normal(k_w, (COUT, CIN, 3, 3), dtype=jnp.float32) * 0.1
    bias = jax.random.normal(k_b, (COUT,), dtype=jnp.float32) * 0.1
    gamma = 1.0 + 0.1 * jax.random.normal(k_g, (COUT,), dtype=jnp.float32)
    beta = 0.1 * jax.random.normal(k_beta, (COUT,), dtype=jnp.float32)

    ref = reference(x, weight, bias, gamma, beta)

    # f32 MXU feed, tile_rows=8 -> tile_pix=128, grid (2, 2): exercises the
    # multi-tile stats pass + Chan combine; tight tolerance vs f32 reference.
    out = jax.block_until_ready(
        conv_bn_relu(x, weight, bias, gamma, beta, tile_rows=8))
    assert out.shape == (N, COUT, H, W)
    assert jnp.allclose(out, ref, atol=1e-4, rtol=1e-4), "f32 kernel mismatch vs reference"

    # bf16 MXU feed (f32 accumulation), auto tile selection: higher matmul
    # throughput path, checked at a bf16-appropriate tolerance.
    out_bf16 = jax.block_until_ready(
        conv_bn_relu(x, weight, bias, gamma, beta, use_bf16=True))
    assert out_bf16.shape == (N, COUT, H, W)
    assert jnp.allclose(out_bf16, ref, atol=1e-1, rtol=1e-1), "bf16 kernel mismatch vs reference"

    print("KERNEL_OK")
</pallas_src>

<mosaic_0001>
module attributes {stable_mosaic.version = 11 : i64} {
  func.func @_stats_kernel(%arg0: i32, %arg1: i32, %arg2: memref<1x18x18x4xf32, #tpu.memory_space<vmem>>, %arg3: memref<36x8xf32, #tpu.memory_space<vmem>>, %arg4: memref<1x1x2x8xf32, #tpu.memory_space<vmem>>) attributes {dimension_semantics = [#tpu.dimension_semantics<parallel>, #tpu.dimension_semantics<parallel>], iteration_bounds = array<i64: 2, 2>, scalar_prefetch = 0 : i64, scratch_operands = 0 : i64, tpu.core_type = #tpu.core_type<tc>, window_params = [{transform_indices = @transform_0, window_bounds = array<i64: 1, 18, 18, 4>}, {pipeline_mode = #tpu.pipeline_mode<synchronous>, transform_indices = @transform_1, window_bounds = array<i64: 36, 8>}, {transform_indices = @transform_2, window_bounds = array<i64: 1, 1, 2, 8>}]} {
    %c8_i32 = arith.constant 8 : i32
    %0 = arith.muli %arg1, %c8_i32 : i32
    %1 = tpu.assume_multiple %0, 8 : i32
    %c0_i32 = arith.constant 0 : i32
    %2 = arith.addi %1, %c0_i32 : i32
    %c0 = arith.constant 0 : index
    %3 = arith.index_cast %2 : i32 to index
    %c0_0 = arith.constant 0 : index
    %c0_1 = arith.constant 0 : index
    %4 = vector.load %arg2[%c0, %3, %c0_0, %c0_1] : memref<1x18x18x4xf32, #tpu.memory_space<vmem>>, vector<1x8x16x4xf32>
    %5 = vector.shape_cast %4 : vector<1x8x16x4xf32> to vector<8x16x4xf32>
    %6 = vector.shape_cast %5 : vector<8x16x4xf32> to vector<128x4xf32>
    %c0_i32_2 = arith.constant 0 : i32
    %7 = arith.addi %1, %c0_i32_2 : i32
    %c0_3 = arith.constant 0 : index
    %8 = arith.index_cast %7 : i32 to index
    %c1 = arith.constant 1 : index
    %c0_4 = arith.constant 0 : index
    %9 = vector.load %arg2[%c0_3, %8, %c1, %c0_4] : memref<1x18x18x4xf32, #tpu.memory_space<vmem>>, vector<1x8x16x4xf32>
    %10 = vector.shape_cast %9 : vector<1x8x16x4xf32> to vector<8x16x4xf32>
    %11 = vector.shape_cast %10 : vector<8x16x4xf32> to vector<128x4xf32>
    %c0_i32_5 = arith.constant 0 : i32
    %12 = arith.addi %1, %c0_i32_5 : i32
    %c0_6 = arith.constant 0 : index
    %13 = arith.index_cast %12 : i32 to index
    %c2 = arith.constant 2 : index
    %c0_7 = arith.constant 0 : index
    %14 = vector.load %arg2[%c0_6, %13, %c2, %c0_7] : memref<1x18x18x4xf32, #tpu.memory_space<vmem>>, vector<1x8x16x4xf32>
    %15 = vector.shape_cast %14 : vector<1x8x16x4xf32> to vector<8x16x4xf32>
    %16 = vector.shape_cast %15 : vector<8x16x4xf32> to vector<128x4xf32>
    %c1_i32 = arith.constant 1 : i32
    %17 = arith.addi %1, %c1_i32 : i32
    %c0_8 = arith.constant 0 : index
    %18 = arith.index_cast %17 : i32 to index
    %c0_9 = arith.constant 0 : index
    %c0_10 = arith.constant 0 : index
    %19 = vector.load %arg2[%c0_8, %18, %c0_9, %c0_10] : memref<1x18x18x4xf32, #tpu.memory_space<vmem>>, vector<1x8x16x4xf32>
    %20 = vector.shape_cast %19 : vector<1x8x16x4xf32> to vector<8x16x4xf32>
    %21 = vector.shape_cast %20 : vector<8x16x4xf32> to vector<128x4xf32>
    %c1_i32_11 = arith.constant 1 : i32
    %22 = arith.addi %1, %c1_i32_11 : i32
    %c0_12 = arith.constant 0 : index
    %23 = arith.index_cast %22 : i32 to index
    %c1_13 = arith.constant 1 : index
    %c0_14 = arith.constant 0 : index
    %24 = vector.load %arg2[%c0_12, %23, %c1_13, %c0_14] : memref<1x18x18x4xf32, #tpu.memory_space<vmem>>, vector<1x8x16x4xf32>
    %25 = vector.shape_cast %24 : vector<1x8x16x4xf32> to vector<8x16x4xf32>
    %26 = vector.shape_cast %25 : vector<8x16x4xf32> to vector<128x4xf32>
    %c1_i32_15 = arith.constant 1 : i32
    %27 = arith.addi %1, %c1_i32_15 : i32
    %c0_16 = arith.constant 0 : index
    %28 = arith.index_cast %27 : i32 to index
    %c2_17 = arith.constant 2 : index
    %c0_18 = arith.constant 0 : index
    %29 = vector.load %arg2[%c0_16, %28, %c2_17, %c0_18] : memref<1x18x18x4xf32, #tpu.memory_space<vmem>>, vector<1x8x16x4xf32>
    %30 = vector.shape_cast %29 : vector<1x8x16x4xf32> to vector<8x16x4xf32>
    %31 = vector.shape_cast %30 : vector<8x16x4xf32> to vector<128x4xf32>
    %c2_i32 = arith.constant 2 : i32
    %32 = arith.addi %1, %c2_i32 : i32
    %c0_19 = arith.constant 0 : index
    %33 = arith.index_cast %32 : i32 to index
    %c0_20 = arith.constant 0 : index
    %c0_21 = arith.constant 0 : index
    %34 = vector.load %arg2[%c0_19, %33, %c0_20, %c0_21] : memref<1x18x18x4xf32, #tpu.memory_space<vmem>>, vector<1x8x16x4xf32>
    %35 = vector.shape_cast %34 : vector<1x8x16x4xf32> to vector<8x16x4xf32>
    %36 = vector.shape_cast %35 : vector<8x16x4xf32> to vector<128x4xf32>
    %c2_i32_22 = arith.constant 2 : i32
    %37 = arith.addi %1, %c2_i32_22 : i32
    %c0_23 = arith.constant 0 : index
    %38 = arith.index_cast %37 : i32 to index
    %c1_24 = arith.constant 1 : index
    %c0_25 = arith.constant 0 : index
    %39 = vector.load %arg2[%c0_23, %38, %c1_24, %c0_25] : memref<1x18x18x4xf32, #tpu.memory_space<vmem>>, vector<1x8x16x4xf32>
    %40 = vector.shape_cast %39 : vector<1x8x16x4xf32> to vector<8x16x4xf32>
    %41 = vector.shape_cast %40 : vector<8x16x4xf32> to vector<128x4xf32>
    %c2_i32_26 = arith.constant 2 : i32
    %42 = arith.addi %1, %c2_i32_26 : i32
    %c0_27 = arith.constant 0 : index
    %43 = arith.index_cast %42 : i32 to index
    %c2_28 = arith.constant 2 : index
    %c0_29 = arith.constant 0 : index
    %44 = vector.load %arg2[%c0_27, %43, %c2_28, %c0_29] : memref<1x18x18x4xf32, #tpu.memory_space<vmem>>, vector<1x8x16x4xf32>
    %45 = vector.shape_cast %44 : vector<1x8x16x4xf32> to vector<8x16x4xf32>
    %46 = vector.shape_cast %45 : vector<8x16x4xf32> to vector<128x4xf32>
    %47 = tpu.concatenate %6, %11, %16, %21, %26, %31, %36, %41, %46 in 1 : vector<128x4xf32>, vector<128x4xf32>, vector<128x4xf32>, vector<128x4xf32>, vector<128x4xf32>, vector<128x4xf32>, vector<128x4xf32>, vector<128x4xf32>, vector<128x4xf32> -> vector<128x36xf32>
    %c0_30 = arith.constant 0 : index
    %c0_31 = arith.constant 0 : index
    %48 = vector.load %arg3[%c0_30, %c0_31] : memref<36x8xf32, #tpu.memory_space<vmem>>, vector<36x8xf32>
    %cst = arith.constant dense<0.000000e+00> : vector<128x8xf32>
    %49 = tpu.matmul %47, %48, %cst {dimension_numbers = #tpu.dot_dimension_numbers<[1], [0], [0], [1], [0, 0, 1, 1], [], []>} : vector<128x36xf32>, vector<36x8xf32>, vector<128x8xf32> -> vector<128x8xf32>
    %cst_32 = arith.constant dense<0.000000e+00> : vector<8xf32>
    %50 = vector.multi_reduction <add>, %49, %cst_32 [0] : vector<128x8xf32> to vector<8xf32>
    %51 = vector.shape_cast %50 : vector<8xf32> to vector<1x8xf32>
    %cst_33 = arith.constant 7.812500e-03 : f32
    %52 = vector.broadcast %cst_33 : f32 to vector<1x8xf32>
    %53 = arith.mulf %51, %52 : vector<1x8xf32>
    %54 = vector.broadcast %53 : vector<1x8xf32> to vector<128x8xf32>
    %55 = arith.subf %49, %54 : vector<128x8xf32>
    %56 = arith.mulf %55, %55 : vector<128x8xf32>
    %cst_34 = arith.constant dense<0.000000e+00> : vector<8xf32>
    %57 = vector.multi_reduction <add>, %56, %cst_34 [0] : vector<128x8xf32> to vector<8xf32>
    %58 = vector.shape_cast %57 : vector<8xf32> to vector<1x8xf32>
    %59 = tpu.concatenate %51, %58 in 0 : vector<1x8xf32>, vector<1x8xf32> -> vector<2x8xf32>
    %c0_35 = arith.constant 0 : index
    %c0_36 = arith.constant 0 : index
    %c0_37 = arith.constant 0 : index
    %c0_38 = arith.constant 0 : index
    %60 = vector.load %arg4[%c0_35, %c0_36, %c0_37, %c0_38] : memref<1x1x2x8xf32, #tpu.memory_space<vmem>>, vector<1x1x2x8xf32>
    %61 = vector.shape_cast %60 : vector<1x1x2x8xf32> to vector<2x8xf32>
    %62 = vector.shape_cast %59 : vector<2x8xf32> to vector<1x1x2x8xf32>
    tpu.vector_store %arg4[%c0_35, %c0_36, %c0_37, %c0_38], %62 {strides = array<i32>} : memref<1x1x2x8xf32, #tpu.memory_space<vmem>>, vector<1x1x2x8xf32>,
    return
  }
  func.func @transform_0(%arg0: i32, %arg1: i32) -> (i32, i32, i32, i32) {
    %c0_i32 = arith.constant 0 : i32
    %c0_i32_0 = arith.constant 0 : i32
    %c0_i32_1 = arith.constant 0 : i32
    %c0_i32_2 = arith.constant 0 : i32
    return %arg0, %c0_i32, %c0_i32_0, %c0_i32_1 : i32, i32, i32, i32
  }
  func.func @transform_1(%arg0: i32, %arg1: i32) -> (i32, i32) {
    %c0_i32 = arith.constant 0 : i32
    %c0_i32_0 = arith.constant 0 : i32
    %c0_i32_1 = arith.constant 0 : i32
    return %c0_i32, %c0_i32_0 : i32, i32
  }
  func.func @transform_2(%arg0: i32, %arg1: i32) -> (i32, i32, i32, i32) {
    %c0_i32 = arith.constant 0 : i32
    %c0_i32_0 = arith.constant 0 : i32
    %c0_i32_1 = arith.constant 0 : i32
    return %arg0, %arg1, %c0_i32, %c0_i32_0 : i32, i32, i32, i32
  }
}

</mosaic_0001>

<bundles_post_ra>
// kernel: tpu_custom_call.1
= control target key start
LH: loop header
LB: loop body
LE: loop exit
PB: predicated region body
PF: predicated region fallthrough
CT: control target
= control target key end

     0   :  { %7 = vsyncpa [#allocation3], 0  ;;  %s2433_s0 = inlined_call_operand.vmem [shape: f32[2,18,18,4], index: 0, kind: input, shape index: {}]   ;;  %s2434_s1 = inlined_call_operand.vmem [shape: f32[36,8], index: 1, kind: input, shape index: {}]   ;;  %s2435_s2 = inlined_call_operand.hbm [shape: f32[2,2,2,8], index: 2, kind: output, shape index: {}]  }
   0x1   :  { %9 = vsyncpa [#allocation3 + $0x1], 0  ;;  %s1769_s9 = smov 0   ;;  %s1771_s10 = smov 0  }
   0x2   :  { %s1773_s11 = smov 0   ;;  %s1775_s12 = smov 0  }
   0x3   :  { %s1777_s13 = smov 0   ;;  %s1779_s14 = smov 0  }
   0x4   :  { %s1781_s15 = smov 0   ;;  %s1783_s16 = smov 0  }
   0x5 LB: > { %s1369_s17 = sadd.s32 4294967295, %s1743_s16   ;;  %s1370_s18 = sadd.s32 4294967294, %s1743_s16   ;;  %s1743_s16 = sphi %s1783_s16, %s15_s16   ;;  %s1739_s15 = sphi %s1781_s15, %s2444_s15   ;;  %s1735_s14 = sphi %s1779_s14, %s2443_s14   ;;  %s1731_s13 = sphi %s1777_s13, %s2442_s13   ;;  %s1727_s12 = sphi %s1775_s12, %s2441_s12   ;;  %s1723_s11 = sphi %s1773_s11, %s2440_s11   ;;  %s1719_s10 = sphi %s1771_s10, %s2439_s10   ;;  %s1715_s9 = sphi %s1769_s9, %s2438_s9  }
   0x6   : > { %s24_s19 = sadd.s32 1, %s1735_s14  ;;  %s27_s20 = sadd.s32 1, %s1739_s15 }
   0x7   : > { %p25_p0 = scmp.ge.s32.totalorder %s24_s19, 2  ;;  %p93_p1 = scmp.ne.s32.totalorder %s1723_s11, %s1719_s10 }
   0x8   : > { %p94_p2 = scmp.eq.s32.totalorder %s1369_s17, 3  ;;  %p99_p5 = scmp.ne.s32.totalorder %s1719_s10, %s1715_s9 }
   0x9   : > { %s2446_s19 = smov (%p25_p0, %s24_s19), 0  ;;  %s2448_s20 = smov (!%p25_p0, %s27_s20), %s1739_s15 }
   0xa   : > { %s79_s21 = ssub.s32 %s1735_s14, %s2446_s19  ;;  %p1820_p3 = por %p94_p2, %p93_p1 }
   0xb   : > { %p29_p4 = scmp.ge.s32.totalorder %s2448_s20, 2  ;;  %p100_p6 = scmp.eq.s32.totalorder %s1370_s18, 3 }
   0xc   : > { %p1373_p7 = scmp.ge.s32.totalorder %s1743_s16, 1  ;;  %p129_p9 = scmp.lt.s32.totalorder %s1743_s16, 5 }
   0xd   : > { %s2450_s20 = smov (%p29_p4, %s2448_s20), 0  ;;  %p1829_p8 = por %p100_p6, %p99_p5 }
   0xe   : > { %s78_s24 = ssub.s32 %s1739_s15, %s2450_s20  ;;  %s83_s25 = sadd.s32 1, %s1723_s11 }
   0xf   : > { %s80_s26 = sor.u32 %s79_s21, %s78_s24  ;;  %p130_p10 = pnand %p1373_p7, %p129_p9 }
  0x10   : > { %p81_p11 = scmp.eq.s32.totalorder %s80_s26, 0  ;;  %p151_p12 = scmp.lt.s32.totalorder (!%p130_p10), %s1731_s13, 1  ;;  %v957_v11 = vld [vmem:[%s2434_s1] sm:$0xff] (!%p130_p10)  ;;  %v958_v12 = vld [vmem:[%s2434_s1 + $0x8] sm:$0xff] (!%p130_p10)  ;;  %v959_v14 = vld [vmem:[%s2434_s1 + $0x10] sm:$0xff] (!%p130_p10)  ;;  %vm1011_vm0 = vcmask (!%p130_p10), 1043456  }
  0x11   : > { %133 = sbr.rel (%p130_p10) target bundleno = 697 (0x2b9), region = 28  ;;  %s1745_s7 = smov (!%p130_p10), 8   ;;  %v1555_v13 = vpack.c.bf16 (!%p130_p10), %v958_v12, %v957_v11  ;;  %v960_v15 = vld [vmem:[%s2434_s1 + $0x18] sm:$0xff] (!%p130_p10)  ;;  %v961_v19 = vld [vmem:[%s2434_s1 + $0x20] sm:$0xf] (!%p130_p10)  ;;  %vm821_vm1 = vcmask (!%p130_p10), 31744  }
  0x12   : > { %s1838_s27 = scalar_select %p81_p11, %s1723_s11, %s83_s25  }
  0x13   : > { %s1377_s29 = smul.u32 (!%p130_p10), 192, %s1727_s12  ;;  %s1746_s8 = smov (!%p130_p10), 4   ;;  %1556 = vmatprep.subr.bf16.mxu0 (!%p130_p10), %v1555_v13  ;;  %1563 = vmatprep.subr.bf16.mxu1 (!%p130_p10), %v1555_v13  ;;  %v1559_v18 = vpack.c.bf16 (!%p130_p10), %v960_v15, %v959_v14  ;;  %vm838_vm2 = vcmask (!%p130_p10), 64512   ;;  %vm855_vm3 = vcmask (!%p130_p10), 97280   ;;  %vm872_vm4 = vcmask (!%p130_p10), 130048  }
  0x14   : > { %s1747_s17 = smov (!%p130_p10), 12   ;;  %s1748_s18 = smov (!%p130_p10), 16   ;;  %1558 = vmatpush3.bf16.msra.mxu0 (!%p130_p10), %v1555_v13  ;;  %1566 = vmatpush3.bf16.msra.mxu1 (!%p130_p10), %v1555_v13  ;;  %vm889_vm5 = vcmask (!%p130_p10), 162816   ;;  %vm906_vm6 = vcmask (!%p130_p10), 195584   ;;  %vm923_vm7 = vcmask (!%p130_p10), 228352   ;;  %vm940_vm8 = vcmask (!%p130_p10), 261120  }
  0x15   : > { %s1749_s21 = smov (!%p130_p10), 20   ;;  %1560 = vmatprep.subr.bf16.mxu0 (!%p130_p10), %v1559_v18  ;;  %1564 = vmatprep.subr.bf16.mxu1 (!%p130_p10), %v1559_v18  ;;  %s1751_s24 = smov (!%p130_p10), 28   ;;  %vm962_vm9 = vcmask (!%p130_p10), 293888   ;;  %vm1267_vm10 = vcmask (!%p130_p10), 1040384   ;;  %vm1269_vm11 = vcmask (!%p130_p10), 58368  }
  0x18   : > { %s152_s28 = scalar_select %p151_p12, %s1731_s13, 1  ;;  %1562 = vmatpush3.bf16.msra.mxu0 %v1559_v18  ;;  %1567 = vmatpush3.bf16.msra.mxu1 %v1559_v18 }
  0x19   : > { %1529 = vmatprep.subr.msk.mxu0 %vm1011_vm0, %v961_v19  ;;  %1565 = vmatprep.subr.msk.mxu1 %vm1011_vm0, %v961_v19 }
  0x1a   : > { %s1569_s30 = smul.u32 432, %s152_s28  ;;  %s1752_s28 = smov 32  }
  0x1c   : > { %s155_s5 = scalar_lea.vmem %s2433_s0, %s1569_s30  ;;  %1530 = vmatpush3.msk.msra.mxu0 %vm1011_vm0, %v961_v19  ;;  %1568 = vmatpush3.msk.msra.mxu1 %vm1011_vm0, %v961_v19 }
  0x1d   : > { %s1846_s6 = scalar_lea.vmem %s155_s5, %s1377_s29  ;;  %s1750_s29 = smov 24  }
  0x1e   : > { %v191_v0 = vld [vmem:[%s1846_s6 + $0x2] sm:$0xff]  ;;  %v192_v2 = vld [vmem:[%s1846_s6 + $0xa] sm:$0xff]  ;;  %v1860_v5 = vld [vmem:[%s1846_s6 + $0x18] sm:$0xff]  ;;  %s1753_s5 = smov [#allocation2]  }
  0x1f   : > { %v175_v1 = vld [vmem:[%s1846_s6 + $0x1] sm:$0xff]  ;;  %389 = vrot.lane.b32.xlu1 %v191_v0, %s1745_s7  ;;  %v176_v3 = vld [vmem:[%s1846_s6 + $0x9] sm:$0xff]  ;;  %v177_v6 = vld [vmem:[%s1846_s6 + $0x19] sm:$0xff] }
  0x20   : > { %325 = vrot.lane.b32.xlu0 %v175_v1, %s1746_s8  ;;  %v1857_v4 = vld [vmem:[%s1846_s6 + $0x20] sm:$0xff]  ;;  %v1876_v9 = vld [vmem:[%s1846_s6 + $0x30] sm:$0xff]  ;;  %v1899_v17 = vld [vmem:[%s1846_s6 + $0x38] sm:$0xff] }
  0x21   : > { %v1412_v7 = vld [vmem:[%s1846_s6 + $0x1a] sm:$0xff]  ;;  %v1413_v10 = vld [vmem:[%s1846_s6 + $0x22] sm:$0xff]  ;;  %v1446_v16 = vld [vmem:[%s1846_s6 + $0x31] sm:$0xff] }
  0x22   : > { %v1397_v8 = vld [vmem:[%s1846_s6 + $0x21] sm:$0xff]  ;;  %v1462_v20 = vld [vmem:[%s1846_s6 + $0x32] sm:$0xff]  ;;  %v1448_v24 = vld [vmem:[%s1846_s6 + $0x49] sm:$0xff] }
  0x23   : > { %391 = vrot.lane.b32.xlu1 %v192_v2, %s1745_s7  ;;  %v1447_v21 = vld [vmem:[%s1846_s6 + $0x39] sm:$0xff]  ;;  %v1922_v23 = vld [vmem:[%s1846_s6 + $0x48] sm:$0xff]  ;;  %v1932_v25 = vld [vmem:[%s1846_s6 + $0x50] sm:$0xff] }
  0x24   : > { %327 = vrot.lane.b32.xlu0 %v176_v3, %s1746_s8  ;;  %v1463_v22 = vld [vmem:[%s1846_s6 + $0x3a] sm:$0xff]  ;;  %v1464_v26 = vld [vmem:[%s1846_s6 + $0x4a] sm:$0xff]  ;;  %v1465_v28 = vld [vmem:[%s1846_s6 + $0x52] sm:$0xff] }
  0x25   : > { %v1449_v27 = vld [vmem:[%s1846_s6 + $0x51] sm:$0xff]  ;;  %v1952_v29 = vld [vmem:[%s1846_s6 + $0x60] sm:$0xff]  ;;  %v1962_v31 = vld [vmem:[%s1846_s6 + $0x68] sm:$0xff] }
  0x26   : > { %v1450_v30 = vld [vmem:[%s1846_s6 + $0x61] sm:$0xff]  ;;  %v1451_v33 = vld [vmem:[%s1846_s6 + $0x69] sm:$0xff]  ;;  %v1982_v37 = vld [vmem:[%s1846_s6 + $0x78] sm:$0xff] }
  0x27   : > { %455 = vrot.lane.b32.xlu1 %v1857_v4, %s1747_s17  ;;  %v1466_v32 = vld [vmem:[%s1846_s6 + $0x62] sm:$0xff]  ;;  %v1467_v34 = vld [vmem:[%s1846_s6 + $0x6a] sm:$0xff]  ;;  %v1452_v42 = vld [vmem:[%s1846_s6 + $0x79] sm:$0xff] }
  0x28   : > { %453 = vrot.lane.b32.xlu0 %v1860_v5, %s1747_s17  ;;  %v1996_v43 = vld [vmem:[%s1846_s6 + $0x80] sm:$0xff]  ;;  %v2029_v62 = vld [vmem:[%s1846_s6 + $0x90] sm:$0xff]  ;;  %v160_v2 = vld [vmem:[%s1846_s6 + $0x8] sm:$0xff] }
  0x29   : > { %v1468_v48 = vld [vmem:[%s1846_s6 + $0x7a] sm:$0xff]  ;;  %v1469_v54 = vld [vmem:[%s1846_s6 + $0x82] sm:$0xff]  ;;  %v1454_v15 = vld [vmem:[%s1846_s6 + $0x91] sm:$0xff] }
  0x2a   : > { %v1453_v49 = vld [vmem:[%s1846_s6 + $0x81] sm:$0xff] }
  0x2b   : > { %329 = vrot.lane.b32.xlu1 %v177_v6, %s1746_s8  ;;  %v159_v57 = vld [vmem:[%s1846_s6] sm:$0xff] }
  0x2c   : > { %517 = vrot.lane.b32.xlu0 %v177_v6, %s1748_s18 }
  0x2f   : > { %581 = vrot.lane.b32.xlu1 %v1412_v7, %s1749_s21 }
  0x30   : > { %519 = vrot.lane.b32.xlu0 %v1397_v8, %s1748_s18 }
  0x33   : > { %393 = vrot.lane.b32.xlu1 %v1412_v7, %s1745_s7 }
  0x34   : > { %331 = vrot.lane.b32.xlu0 %v1397_v8, %s1746_s8 }
  0x37   : > { %645 = vrot.lane.b32.xlu1 %v1876_v9, %s1750_s29 }
  0x38   : > { %583 = vrot.lane.b32.xlu0 %v1413_v10, %s1749_s21 }
  0x3b   : > { %457 = vrot.lane.b32.xlu1 %v1876_v9, %s1747_s17 }
  0x3c   : > { %395 = vrot.lane.b32.xlu0 %v1413_v10, %s1745_s7 }
  0x3f   : > { %709 = vrot.lane.b32.xlu1 %v1446_v16, %s1751_s24 }
  0x40   : > { %647 = vrot.lane.b32.xlu0 %v1899_v17, %s1750_s29 }
  0x43   : > { %521 = vrot.lane.b32.xlu1 %v1446_v16, %s1748_s18 }
  0x44   : > { %459 = vrot.lane.b32.xlu0 %v1899_v17, %s1747_s17 }
  0x47   : > { %773 = vrot.lane.b32.xlu1 %v1462_v20, %s1752_s28 }
  0x48   : > { %711 = vrot.lane.b32.xlu0 %v1447_v21, %s1751_s24 }
  0x4b   : > { %523 = vrot.lane.b32.xlu1 %v1447_v21, %s1748_s18 }
  0x4c   : > { %333 = vrot.lane.b32.xlu0 %v1446_v16, %s1746_s8  ;;  %v2054_v16 = vld [vmem:[%s1846_s6 + $0x98] sm:$0xff] }
  0x4f   : > { %775 = vrot.lane.b32.xlu1 %v1463_v22, %s1752_s28 }
  0x50   : > { %585 = vrot.lane.b32.xlu0 %v1462_v20, %s1749_s21 }
  0x53   : > { %397 = vrot.lane.b32.xlu1 %v1462_v20, %s1745_s7 }
  0x54   : > { %335 = vrot.lane.b32.xlu0 %v1447_v21, %s1746_s8 }
  0x57   : > { %649 = vrot.lane.b32.xlu1 %v1922_v23, %s1750_s29 }
  0x58   : > { %587 = vrot.lane.b32.xlu0 %v1463_v22, %s1749_s21 }
  0x5b   : > { %461 = vrot.lane.b32.xlu1 %v1922_v23, %s1747_s17 }
  0x5c   : > { %399 = vrot.lane.b32.xlu0 %v1463_v22, %s1745_s7 }
  0x5f   : > { %713 = vrot.lane.b32.xlu1 %v1448_v24, %s1751_s24 }
  0x60   : > { %651 = vrot.lane.b32.xlu0 %v1932_v25, %s1750_s29 }
  0x63   : > { %525 = vrot.lane.b32.xlu1 %v1448_v24, %s1748_s18 }
  0x64   : > { %463 = vrot.lane.b32.xlu0 %v1932_v25, %s1747_s17 }
  0x67   : > { %777 = vrot.lane.b32.xlu1 %v1464_v26, %s1752_s28 }
  0x68   : > { %715 = vrot.lane.b32.xlu0 %v1449_v27, %s1751_s24 }
  0x6b   : > { %527 = vrot.lane.b32.xlu1 %v1449_v27, %s1748_s18 }
  0x6c   : > { %337 = vrot.lane.b32.xlu0 %v1448_v24, %s1746_s8 }
  0x6f   : > { %779 = vrot.lane.b32.xlu1 %v1465_v28, %s1752_s28 }
  0x70   : > { %589 = vrot.lane.b32.xlu0 %v1464_v26, %s1749_s21 }
  0x73   : > { %401 = vrot.lane.b32.xlu1 %v1464_v26, %s1745_s7 }
  0x74   : > { %339 = vrot.lane.b32.xlu0 %v1449_v27, %s1746_s8 }
  0x77   : > { %653 = vrot.lane.b32.xlu1 %v1952_v29, %s1750_s29 }
  0x78   : > { %591 = vrot.lane.b32.xlu0 %v1465_v28, %s1749_s21 }
  0x7b   : > { %465 = vrot.lane.b32.xlu1 %v1952_v29, %s1747_s17 }
  0x7c   : > { %403 = vrot.lane.b32.xlu0 %v1465_v28, %s1745_s7 }
  0x7f   : > { %717 = vrot.lane.b32.xlu1 %v1450_v30, %s1751_s24 }
  0x80   : > { %655 = vrot.lane.b32.xlu0 %v1962_v31, %s1750_s29 }
  0x83   : > { %529 = vrot.lane.b32.xlu1 %v1450_v30, %s1748_s18 }
  0x84   : > { %467 = vrot.lane.b32.xlu0 %v1962_v31, %s1747_s17 }
  0x87   : > { %781 = vrot.lane.b32.xlu1 %v1466_v32, %s1752_s28 }
  0x88   : > { %719 = vrot.lane.b32.xlu0 %v1451_v33, %s1751_s24 }
  0x8b   : > { %531 = vrot.lane.b32.xlu1 %v1451_v33, %s1748_s18 }
  0x8c   : > { %341 = vrot.lane.b32.xlu0 %v1450_v30, %s1746_s8 }
  0x8f   : > { %783 = vrot.lane.b32.xlu1 %v1467_v34, %s1752_s28 }
  0x90   : > { %593 = vrot.lane.b32.xlu0 %v1466_v32, %s1749_s21 }
  0x91   : > { %v390_v35 = vpop.permute.xlu1 %389 }
  0x92   : > { %v326_v36 = vpop.permute.xlu0 %325 }
  0x93   : > { %405 = vrot.lane.b32.xlu1 %v1466_v32, %s1745_s7  ;;  %v822_v58 = vsel %vm821_vm1, %v159_v57, %v326_v36  ;;  %v1470_v32 = vld [vmem:[%s1846_s6 + $0x92] sm:$0xff] }
  0x94   : > { %343 = vrot.lane.b32.xlu0 %v1451_v33, %s1746_s8  ;;  %v839_v61 = vsel %vm838_vm2, %v822_v58, %v390_v35  ;;  %v1455_v33 = vld [vmem:[%s1846_s6 + $0x99] sm:$0xff] }
  0x95   : > { %v1984_v38 = vpop.permute.xlu1 %391 }
  0x96   : > { %v328_v39 = vpop.permute.xlu0 %327 }
  0x97   : > { %657 = vrot.lane.b32.xlu1 %v1982_v37, %s1750_s29  ;;  %v823_v8 = vsel %vm821_vm1, %v160_v2, %v328_v39  ;;  %v1471_v39 = vld [vmem:[%s1846_s6 + $0x9a] sm:$0xff] }
  0x98   : > { %595 = vrot.lane.b32.xlu0 %v1467_v34, %s1749_s21  ;;  %v840_v14 = vsel %vm838_vm2, %v823_v8, %v1984_v38 }
  0x99   : > { %v1989_v40 = vpop.permute.xlu1 %455 }
  0x9a   : > { %v454_v41 = vpop.permute.xlu0 %453  ;;  %v857_v18 = vsel %vm855_vm3, %v840_v14, %v1989_v40 }
  0x9b   : > { %469 = vrot.lane.b32.xlu1 %v1982_v37, %s1747_s17  ;;  %v856_v63 = vsel %vm855_vm3, %v839_v61, %v454_v41  ;;  %v1456_v61 = vld [vmem:[%s1846_s6 + $0xa9] sm:$0xff] }
  0x9c   : > { %407 = vrot.lane.b32.xlu0 %v1467_v34, %s1745_s7 }
  0x9d   : > { %v1998_v44 = vpop.permute.xlu1 %329 }
  0x9e   : > { %v518_v45 = vpop.permute.xlu0 %517 }
  0x9f   : > { %721 = vrot.lane.b32.xlu1 %v1452_v42, %s1751_s24  ;;  %v873_v3 = vsel %vm872_vm4, %v856_v63, %v518_v45  ;;  %v2123_v63 = vld [vmem:[%s1846_s6 + $0xb0] sm:$0xff] }
  0xa0   : > { %659 = vrot.lane.b32.xlu0 %v1996_v43, %s1750_s29 }
  0xa1   : > { %v582_v46 = vpop.permute.xlu1 %581 }
  0xa2   : > { %v520_v47 = vpop.permute.xlu0 %519  ;;  %v890_v6 = vsel %vm889_vm5, %v873_v3, %v582_v46  ;;  %v824_v46 = vsel %vm821_vm1, %v1860_v5, %v1998_v44 }
  0xa3   : > { %533 = vrot.lane.b32.xlu1 %v1452_v42, %s1748_s18  ;;  %v874_v21 = vsel %vm872_vm4, %v857_v18, %v520_v47  ;;  %v1473_v18 = vld [vmem:[%s1846_s6 + $0xb2] sm:$0xff] }
  0xa4   : > { %471 = vrot.lane.b32.xlu0 %v1996_v43, %s1747_s17 }
  0xa5   : > { %v2008_v50 = vpop.permute.xlu1 %393 }
  0xa6   : > { %v2010_v51 = vpop.permute.xlu0 %331  ;;  %v841_v47 = vsel %vm838_vm2, %v824_v46, %v2008_v50  ;;  %v1458_v46 = vld [vmem:[%s1846_s6 + $0xc1] sm:$0xff] }
  0xa7   : > { %785 = vrot.lane.b32.xlu1 %v1468_v48, %s1752_s28 }
  0xa8   : > { %723 = vrot.lane.b32.xlu0 %v1453_v49, %s1751_s24 }
  0xa9   : > { %v646_v52 = vpop.permute.xlu1 %645 }
  0xaa   : > { %v584_v53 = vpop.permute.xlu0 %583  ;;  %v907_v7 = vsel %vm906_vm6, %v890_v6, %v646_v52 }
  0xab   : > { %535 = vrot.lane.b32.xlu1 %v1453_v49, %s1748_s18  ;;  %v891_v22 = vsel %vm889_vm5, %v874_v21, %v584_v53 }
  0xac   : > { %345 = vrot.lane.b32.xlu0 %v1452_v42, %s1746_s8 }
  0xad   : > { %v2017_v55 = vpop.permute.xlu1 %457 }
  0xae   : > { %v2019_v56 = vpop.permute.xlu0 %395 }
  0xaf   : > { %787 = vrot.lane.b32.xlu1 %v1469_v54, %s1752_s28 }
  0xb0   : > { %597 = vrot.lane.b32.xlu0 %v1468_v48, %s1749_s21 }
  0xb1   : > { %v710_v59 = vpop.permute.xlu1 %709 }
  0xb2   : > { %v648_v60 = vpop.permute.xlu0 %647  ;;  %v924_v10 = vsel %vm923_vm7, %v907_v7, %v710_v59  ;;  %v825_v59 = vsel %vm821_vm1, %v1857_v4, %v2010_v51 }
  0xb3   : > { %409 = vrot.lane.b32.xlu1 %v1468_v48, %s1745_s7  ;;  %v908_v24 = vsel %vm906_vm6, %v891_v22, %v648_v60  ;;  %v2097_v48 = vld [vmem:[%s1846_s6 + $0xa8] sm:$0xff]  ;;  %v842_v60 = vsel %vm838_vm2, %v825_v59, %v2019_v56 }
  0xb4   : > { %347 = vrot.lane.b32.xlu0 %v1453_v49, %s1746_s8  ;;  %v858_v49 = vsel %vm855_vm3, %v841_v47, %v2017_v55  ;;  %v1443_v47 = vld [vmem:[%s1846_s6 + $0xc8] sm:$0xff] }
  0xb5   : > { %v2032_v0 = vpop.permute.xlu1 %521 }
  0xb6   : > { %v2034_v1 = vpop.permute.xlu0 %459  ;;  %v875_v5 = vsel %vm872_vm4, %v858_v49, %v2032_v0 }
  0xb7   : > { %661 = vrot.lane.b32.xlu1 %v2029_v62, %s1750_s29  ;;  %v859_v0 = vsel %vm855_vm3, %v842_v60, %v2034_v1 }
  0xb8   : > { %599 = vrot.lane.b32.xlu0 %v1469_v54, %s1749_s21 }
  0xb9   : > { %v774_v11 = vpop.permute.xlu1 %773 }
  0xba   : > { %v712_v12 = vpop.permute.xlu0 %711  ;;  %v941_v13 = vsel %vm940_vm8, %v924_v10, %v774_v11  ;;  %v1472_v10 = vld [vmem:[%s1846_s6 + $0xaa] sm:$0xff] }
  0xbb   : > { %473 = vrot.lane.b32.xlu1 %v2029_v62, %s1747_s17  ;;  %1531 = vmatprep.mubr.msk.f32.mxu0 %vm962_vm9, %v941_v13  ;;  %v925_v26 = vsel %vm923_vm7, %v908_v24, %v712_v12  ;;  %v1457_v11 = vld [vmem:[%s1846_s6 + $0xb1] sm:$0xff] }
  0xbc   : > { %411 = vrot.lane.b32.xlu0 %v1469_v54, %s1745_s7 }
  0xbd   : > { %v524_v19 = vpop.permute.xlu1 %523 }
  0xbe   : > { %v2058_v20 = vpop.permute.xlu0 %333  ;;  %v876_v51 = vsel %vm872_vm4, %v859_v0, %v524_v19  ;;  %v1427_v0 = vld [vmem:[%s1846_s6 + $0xca] sm:$0xff] }
  0xbf   : > { %725 = vrot.lane.b32.xlu1 %v1454_v15, %s1751_s24 }
  0xc0   : > { %663 = vrot.lane.b32.xlu0 %v2054_v16, %s1750_s29 }
  0xc1   : > { %v776_v27 = vpop.permute.xlu1 %775 }
  0xc2   : > { %v586_v28 = vpop.permute.xlu0 %585  ;;  %v942_v30 = vsel %vm940_vm8, %v925_v26, %v776_v27  ;;  %v826_v26 = vsel %vm821_vm1, %v1876_v9, %v2058_v20 }
  0xc3   : > { %537 = vrot.lane.b32.xlu1 %v1454_v15, %s1748_s18  ;;  %1532 = vmatmul.mubr.msk.f32.vlgmr.msra.gmra.mrb[0].mxu0 %vm962_vm9, %v942_v30  ;;  %v892_v44 = vsel %vm889_vm5, %v875_v5, %v586_v28  ;;  %v1442_v28 = vld [vmem:[%s1846_s6 + $0xc0] sm:$0xff] }
  0xc4   : > { %475 = vrot.lane.b32.xlu0 %v2054_v16, %s1747_s17 }
  0xc5   : > { %v2074_v34 = vpop.permute.xlu1 %397 }
  0xc6   : > { %v2076_v35 = vpop.permute.xlu0 %335  ;;  %v843_v27 = vsel %vm838_vm2, %v826_v26, %v2074_v34  ;;  %v1476_v26 = vld [vmem:[%s1846_s6 + $0xda] sm:$0xff] }
  0xc7   : > { %789 = vrot.lane.b32.xlu1 %v1470_v32, %s1752_s28 }
  0xc8   : > { %727 = vrot.lane.b32.xlu0 %v1455_v33, %s1751_s24 }
  0xc9   : > { %v650_v36 = vpop.permute.xlu1 %649 }
  0xca   : > { %v588_v38 = vpop.permute.xlu0 %587  ;;  %v909_v50 = vsel %vm906_vm6, %v892_v44, %v650_v36 }
  0xcb   : > { %539 = vrot.lane.b32.xlu1 %v1455_v33, %s1748_s18  ;;  %v893_v3 = vsel %vm889_vm5, %v876_v51, %v588_v38 }
  0xcc   : > { %349 = vrot.lane.b32.xlu0 %v1454_v15, %s1746_s8 }
  0xcd   : > { %v2083_v40 = vpop.permute.xlu1 %461 }
  0xce   : > { %v2085_v41 = vpop.permute.xlu0 %399  ;;  %v860_v30 = vsel %vm855_vm3, %v843_v27, %v2083_v40 }
  0xcf   : > { %791 = vrot.lane.b32.xlu1 %v1471_v39, %s1752_s28 }
  0xd0   : > { %601 = vrot.lane.b32.xlu0 %v1470_v32, %s1749_s21 }
  0xd1   : > { %v714_v42 = vpop.permute.xlu1 %713 }
  0xd2   : > { %v652_v45 = vpop.permute.xlu0 %651  ;;  %v926_v54 = vsel %vm923_vm7, %v909_v50, %v714_v42  ;;  %v827_v42 = vsel %vm821_vm1, %v1899_v17, %v2076_v35 }
  0xd3   : > { %413 = vrot.lane.b32.xlu1 %v1470_v32, %s1745_s7  ;;  %v910_v56 = vsel %vm906_vm6, %v893_v3, %v652_v45  ;;  %v844_v45 = vsel %vm838_vm2, %v827_v42, %v2085_v41  ;;  %v1445_v3 = vld [vmem:[%s1846_s6 + $0xe0] sm:$0xff] }
  0xd4   : > { %351 = vrot.lane.b32.xlu0 %v1455_v33, %s1746_s8 }
  0xd5   : > { %v526_v52 = vpop.permute.xlu1 %525 }
  0xd6   : > { %v2101_v53 = vpop.permute.xlu0 %463  ;;  %v877_v36 = vsel %vm872_vm4, %v860_v30, %v526_v52 }
  0xd7   : > { %665 = vrot.lane.b32.xlu1 %v2097_v48, %s1750_s29  ;;  %v861_v49 = vsel %vm855_vm3, %v844_v45, %v2101_v53 }
  0xd8   : > { %603 = vrot.lane.b32.xlu0 %v1471_v39, %s1749_s21 }
  0xd9   : > { %v778_v55 = vpop.permute.xlu1 %777 }
  0xda   : > { %v716_v57 = vpop.permute.xlu0 %715  ;;  %v943_v58 = vsel %vm940_vm8, %v926_v54, %v778_v55  ;;  %v1474_v55 = vld [vmem:[%s1846_s6 + $0xc2] sm:$0xff] }
  0xdb   : > { %477 = vrot.lane.b32.xlu1 %v2097_v48, %s1747_s17  ;;  %1534 = vmatprep.mubr.msk.f32.mxu0 %vm962_vm9, %v943_v58  ;;  %v927_v6 = vsel %vm923_vm7, %v910_v56, %v716_v57  ;;  %v1459_v57 = vld [vmem:[%s1846_s6 + $0xc9] sm:$0xff]  ;;  %v1444_v56 = vld [vmem:[%s1846_s6 + $0xd8] sm:$0xff] }
  0xdc   : > { %415 = vrot.lane.b32.xlu0 %v1471_v39, %s1745_s7 }
  0xdd   : > { %v528_v2 = vpop.permute.xlu1 %527 }
  0xde   : > { %v2127_v4 = vpop.permute.xlu0 %337  ;;  %v878_v17 = vsel %vm872_vm4, %v861_v49, %v528_v2 }
  0xdf   : > { %729 = vrot.lane.b32.xlu1 %v1456_v61, %s1751_s24 }
  0xe0   : > { %667 = vrot.lane.b32.xlu0 %v2123_v63, %s1750_s29 }
  0xe1   : > { %v780_v7 = vpop.permute.xlu1 %779 }
  0xe2   : > { %v590_v1 = vpop.permute.xlu0 %589  ;;  %v944_v8 = vsel %vm940_vm8, %v927_v6, %v780_v7 }
  0xe3   : > { %541 = vrot.lane.b32.xlu1 %v1456_v61, %s1748_s18  ;;  %1535 = vmatmul.mubr.msk.f32.gmra.mrb[2].mxu0 %vm962_vm9, %v944_v8  ;;  %v894_v9 = vsel %vm889_vm5, %v877_v36, %v590_v1  ;;  %v828_v1 = vsel %vm821_vm1, %v1922_v23, %v2127_v4  ;;  %v1477_v4 = vld [vmem:[%s1846_s6 + $0xe2] sm:$0xff] }
  0xe4   : > { %479 = vrot.lane.b32.xlu0 %v2123_v63, %s1747_s17 }
  0xe5   : > { %v2143_v12 = vpop.permute.xlu1 %401 }
  0xe6   : > { %v2145_v13 = vpop.permute.xlu0 %339  ;;  %v845_v8 = vsel %vm838_vm2, %v828_v1, %v2143_v12 }
  0xe7   : > { %793 = vrot.lane.b32.xlu1 %v1472_v10, %s1752_s28  ;;  %v829_v30 = vsel %vm821_vm1, %v1932_v25, %v2145_v13 }
  0xe8   : > { %731 = vrot.lane.b32.xlu0 %v1457_v11, %s1751_s24 }
  0xe9   : > { %v654_v14 = vpop.permute.xlu1 %653 }
  0xea   : > { %v592_v15 = vpop.permute.xlu0 %591  ;;  %v911_v20 = vsel %vm906_vm6, %v894_v9, %v654_v14 }
  0xeb   : > { %543 = vrot.lane.b32.xlu1 %v1457_v11, %s1748_s18  ;;  %v895_v35 = vsel %vm889_vm5, %v878_v17, %v592_v15 }
  0xec   : > { %353 = vrot.lane.b32.xlu0 %v1456_v61, %s1746_s8 }
  0xed   : > { %v2152_v19 = vpop.permute.xlu1 %465 }
  0xee   : > { %v2154_v21 = vpop.permute.xlu0 %403  ;;  %v862_v14 = vsel %vm855_vm3, %v845_v8, %v2152_v19 }
  0xef   : > { %795 = vrot.lane.b32.xlu1 %v1473_v18, %s1752_s28 }
  0xf0   : > { %605 = vrot.lane.b32.xlu0 %v1472_v10, %s1749_s21 }
  0xf1   : > { %v718_v22 = vpop.permute.xlu1 %717 }
  0xf2   : > { %v656_v24 = vpop.permute.xlu0 %655  ;;  %v928_v34 = vsel %vm923_vm7, %v911_v20, %v718_v22 }
  0xf3   : > { %417 = vrot.lane.b32.xlu1 %v1472_v10, %s1745_s7  ;;  %v912_v41 = vsel %vm906_vm6, %v895_v35, %v656_v24  ;;  %v1461_v10 = vld [vmem:[%s1846_s6 + $0xe1] sm:$0xff] }
  0xf4   : > { %355 = vrot.lane.b32.xlu0 %v1457_v11, %s1746_s8  ;;  %v1460_v11 = vld [vmem:[%s1846_s6 + $0xd9] sm:$0xff]  ;;  %s148_s6 = sand.u32 1, %s1719_s10   ;;  %s1496_s8 = sshll.u32 %s1731_s13, 1 }
  0xf5   : > { %v530_v32 = vpop.permute.xlu1 %529 }
  0xf6   : > { %v2168_v33 = vpop.permute.xlu0 %467  ;;  %v879_v22 = vsel %vm872_vm4, %v862_v14, %v530_v32  ;;  %v846_v32 = vsel %vm838_vm2, %v829_v30, %v2154_v21 }
  0xf7   : > { %669 = vrot.lane.b32.xlu1 %v1442_v28, %s1750_s29  ;;  %v863_v36 = vsel %vm855_vm3, %v846_v32, %v2168_v33 }
  0xf8   : > { %607 = vrot.lane.b32.xlu0 %v1473_v18, %s1749_s21 }
  0xf9   : > { %v782_v38 = vpop.permute.xlu1 %781 }
  0xfa   : > { %v720_v39 = vpop.permute.xlu0 %719  ;;  %v945_v40 = vsel %vm940_vm8, %v928_v34, %v782_v38 }
  0xfb   : > { %481 = vrot.lane.b32.xlu1 %v1442_v28, %s1747_s17  ;;  %1537 = vmatprep.mubr.msk.f32.mxu0 %vm962_vm9, %v945_v40  ;;  %v929_v44 = vsel %vm923_vm7, %v912_v41, %v720_v39 }
  0xfc   : > { %419 = vrot.lane.b32.xlu0 %v1473_v18, %s1745_s7  ;;  %s1374_s7 = sshll.u32 %s148_s6, 1 }
  0xfd   : > { %v532_v52 = vpop.permute.xlu1 %531 }
  0xfe   : > { %v2189_v5 = vpop.permute.xlu0 %341  ;;  %v880_v34 = vsel %vm872_vm4, %v863_v36, %v532_v52 }
  0xff   : > { %733 = vrot.lane.b32.xlu1 %v1458_v46, %s1751_s24  ;;  %v830_v35 = vsel %vm821_vm1, %v1952_v29, %v2189_v5 }
 0x100   : > { %671 = vrot.lane.b32.xlu0 %v1443_v47, %s1750_s29 }
 0x101   : > { %v784_v50 = vpop.permute.xlu1 %783 }
 0x102   : > { %v594_v54 = vpop.permute.xlu0 %593  ;;  %v946_v53 = vsel %vm940_vm8, %v929_v44, %v784_v50 }
 0x103   : > { %545 = vrot.lane.b32.xlu1 %v1458_v46, %s1748_s18  ;;  %1538 = vmatmul.mubr.msk.f32.gmra.mrb[4].mxu0 %vm962_vm9, %v946_v53  ;;  %v896_v24 = vsel %vm889_vm5, %v879_v22, %v594_v54 }
 0x104   : > { %483 = vrot.lane.b32.xlu0 %v1443_v47, %s1747_s17  ;;  %s1283_s17 = sadd.s32 %s1727_s12, %s1496_s8  ;;  %s1272_s12 = scalar_lea.sflag [#allocation3], %s148_s6 }
 0x105   : > { %v2203_v58 = vpop.permute.xlu1 %405 }
 0x106   : > { %v2205_v59 = vpop.permute.xlu0 %343  ;;  %v847_v41 = vsel %vm838_vm2, %v830_v35, %v2203_v58 }
 0x107   : > { %797 = vrot.lane.b32.xlu1 %v1474_v55, %s1752_s28  ;;  %v831_v29 = vsel %vm821_vm1, %v1962_v31, %v2205_v59 }
 0x108   : > { %735 = vrot.lane.b32.xlu0 %v1459_v57, %s1751_s24 }
 0x109   : > { %v658_v60 = vpop.permute.xlu1 %657 }
 0x10a   : > { %v596_v61 = vpop.permute.xlu0 %595  ;;  %v913_v23 = vsel %vm906_vm6, %v896_v24, %v658_v60 }
 0x10b   : > { %609 = vrot.lane.b32.xlu1 %v1474_v55, %s1749_s21  ;;  %v897_v38 = vsel %vm889_vm5, %v880_v34, %v596_v61 }
 0x10c   : > { %547 = vrot.lane.b32.xlu0 %v1459_v57, %s1748_s18  ;;  %s1497_s18 = sshll.u32 %s1283_s17, 5 }
 0x10d   : > { %v470_v2 = vpop.permute.xlu1 %469  ;;  %s2379_s4 = scalar_lea.hbm %s2435_s2, %s1497_s18 }
 0x10e   : > { %v2212_v51 = vpop.permute.xlu0 %407  ;;  %v864_v44 = vsel %vm855_vm3, %v847_v41, %v470_v2 }
 0x10f   : > { %611 = vrot.lane.b32.xlu1 %v1427_v0, %s1749_s21  ;;  %v848_v5 = vsel %vm838_vm2, %v831_v29, %v2212_v51  ;;  %s150_s21 = scalar_lea.vmem [#allocation2], %s1374_s7 }
 0x110   : > { %799 = vrot.lane.b32.xlu0 %v1427_v0, %s1752_s28 }
 0x111   : > { %v722_v6 = vpop.permute.xlu1 %721 }
 0x112   : > { %v660_v7 = vpop.permute.xlu0 %659  ;;  %v930_v12 = vsel %vm923_vm7, %v913_v23, %v722_v6 }
 0x113   : > { %675 = vrot.lane.b32.xlu1 %v1445_v3, %s1750_s29  ;;  %v914_v25 = vsel %vm906_vm6, %v897_v38, %v660_v7 }
 0x114   : > { %673 = vrot.lane.b32.xlu0 %v1444_v56, %s1750_s29  ;;  %s1287_s29 = sshll.u32 %s150_s21, 4  ;;  %s2381_s29 = int_to_ptr.vmem [resolvable:$true] %s1287_s29 }
 0x115   : > { %v534_v15 = vpop.permute.xlu1 %533  ;;  %s1649_s13 = scalar_lea.vmem %s2381_s29, 32 }
 0x116   : > { %v472_v18 = vpop.permute.xlu0 %471  ;;  %v881_v53 = vsel %vm872_vm4, %v864_v44, %v534_v15  ;;  %p1650_p13 = scmp.ne.s32.totalorder %s2381_s29, %s1649_s13 }
 0x117   : > { %739 = vrot.lane.b32.xlu1 %v1461_v10, %s1751_s24  ;;  %v865_v58 = vsel %vm855_vm3, %v848_v5, %v472_v18 }
 0x118   : > { %737 = vrot.lane.b32.xlu0 %v1460_v11, %s1751_s24  ;;  %p1651_p0 = pnand %p1650_p13, %p1820_p3  ;;  %s1653_s24 = sshll.u32 %s1753_s5, 4  ;;  %s1654_s24 = int_to_ptr.vmem [resolvable:$false] %s1653_s24 }
 0x119   : > { %v786_v27 = vpop.permute.xlu1 %785  ;;  %s1655_s25 = scalar_lea.vmem %s1654_s24, 64  ;;  %p1656_p2 = scmp.lt.s32.totalorder %s2381_s29, %s1654_s24 }
 0x11a   : > { %v724_v28 = vpop.permute.xlu0 %723  ;;  %v947_v19 = vsel %vm940_vm8, %v930_v12, %v786_v27  ;;  %p1652_p1 = pneg %p1651_p0  ;;  %p1657_p4 = scmp.lt.s32.totalorder %s1655_s25, %s1649_s13 }
 0x11b   : > { %803 = vrot.lane.b32.xlu1 %v1477_v4, %s1752_s28  ;;  %1540 = vmatprep.mubr.msk.f32.mxu0 %vm962_vm9, %v947_v19  ;;  %v931_v13 = vsel %vm923_vm7, %v914_v25, %v724_v28 }
 0x11c   : > { %801 = vrot.lane.b32.xlu0 %v1476_v26, %s1752_s28  ;;  %p1658_p5 = por %p1657_p4, %p1656_p2 }
 0x11d   : > { %v536_v9 = vpop.permute.xlu1 %535 }
 0x11e   : > { %v346_v20 = vpop.permute.xlu0 %345  ;;  %v882_v6 = vsel %vm872_vm4, %v865_v58, %v536_v9  ;;  %p1659_p6 = pnand %p1658_p5, %p1652_p1 }
 0x11f   : > { %v832_v4 = vsel %vm821_vm1, %v1982_v37, %v346_v20 }
 0x121   : > { %v788_v39 = vpop.permute.xlu1 %787 }
 0x122   : > { %v598_v40 = vpop.permute.xlu0 %597  ;;  %v948_v42 = vsel %vm940_vm8, %v931_v13, %v788_v39 }
 0x123   : > { %1541 = vmatmul.mubr.msk.f32.gmra.mrb[6].mxu0 %vm962_vm9, %v948_v42  ;;  %v898_v55 = vsel %vm889_vm5, %v881_v53, %v598_v40 }
 0x125   : > { %v410_v21 = vpop.permute.xlu1 %409 }
 0x126   : > { %v348_v45 = vpop.permute.xlu0 %347  ;;  %v849_v26 = vsel %vm838_vm2, %v832_v4, %v410_v21 }
 0x127   : > { %v833_v37 = vsel %vm821_vm1, %v1996_v43, %v348_v45 }
 0x129   : > { %v662_v46 = vpop.permute.xlu1 %661 }
 0x12a   : > { %v600_v33 = vpop.permute.xlu0 %599  ;;  %v915_v57 = vsel %vm906_vm6, %v898_v55, %v662_v46 }
 0x12b   : > { %v899_v7 = vsel %vm889_vm5, %v882_v6, %v600_v33 }
 0x12d   : > { %v474_v47 = vpop.permute.xlu1 %473 }
 0x12e   : > { %v412_v49 = vpop.permute.xlu0 %411  ;;  %v866_v12 = vsel %vm855_vm3, %v849_v26, %v474_v47 }
 0x12f   : > { %v850_v20 = vsel %vm838_vm2, %v833_v37, %v412_v49 }
 0x131   : > { %v726_v17 = vpop.permute.xlu1 %725 }
 0x132   : > { %v664_v52 = vpop.permute.xlu0 %663  ;;  %v932_v60 = vsel %vm923_vm7, %v915_v57, %v726_v17 }
 0x133   : > { %v916_v1 = vsel %vm906_vm6, %v899_v7, %v664_v52 }
 0x135   : > { %v538_v50 = vpop.permute.xlu1 %537 }
 0x136   : > { %v476_v54 = vpop.permute.xlu0 %475  ;;  %v883_v19 = vsel %vm872_vm4, %v866_v12, %v538_v50 }
 0x137   : > { %v867_v25 = vsel %vm855_vm3, %v850_v20, %v476_v54 }
 0x139   : > { %v790_v61 = vpop.permute.xlu1 %789 }
 0x13a   : > { %v728_v0 = vpop.permute.xlu0 %727  ;;  %v949_v3 = vsel %vm940_vm8, %v932_v60, %v790_v61 }
 0x13b   : > { %1543 = vmatprep.mubr.msk.f32.mxu1 %vm962_vm9, %v949_v3  ;;  %v933_v8 = vsel %vm923_vm7, %v916_v1, %v728_v0 }
 0x13d   : > { %v540_v2 = vpop.permute.xlu1 %539 }
 0x13e   : > { %v350_v56 = vpop.permute.xlu0 %349  ;;  %v884_v40 = vsel %vm872_vm4, %v867_v25, %v540_v2 }
 0x13f   : > { %v834_v54 = vsel %vm821_vm1, %v2029_v62, %v350_v56 }
 0x141   : > { %v792_v10 = vpop.permute.xlu1 %791 }
 0x142   : > { %v602_v11 = vpop.permute.xlu0 %601  ;;  %v950_v31 = vsel %vm940_vm8, %v933_v8, %v792_v10 }
 0x143   : > { %1544 = vmatmul.mubr.msk.f32.vlgmr.msra.gmra.mrb[0].mxu1 %vm962_vm9, %v950_v31  ;;  %v900_v30 = vsel %vm889_vm5, %v883_v19, %v602_v11 }
 0x145   : > { %v414_v59 = vpop.permute.xlu1 %413 }
 0x146   : > { %v352_v51 = vpop.permute.xlu0 %351  ;;  %v851_v53 = vsel %vm838_vm2, %v834_v54, %v414_v59 }
 0x147   : > { %v835_v62 = vsel %vm821_vm1, %v2054_v16, %v352_v51 }
 0x149   : > { %v666_v14 = vpop.permute.xlu1 %665 }
 0x14a   : > { %v604_v15 = vpop.permute.xlu0 %603  ;;  %v917_v32 = vsel %vm906_vm6, %v900_v30, %v666_v14 }
 0x14b   : > { %v901_v42 = vsel %vm889_vm5, %v884_v40, %v604_v15 }
 0x14d   : > { %v478_v18 = vpop.permute.xlu1 %477 }
 0x14e   : > { %v416_v22 = vpop.permute.xlu0 %415  ;;  %v868_v55 = vsel %vm855_vm3, %v851_v53, %v478_v18 }
 0x14f   : > { %v852_v56 = vsel %vm838_vm2, %v835_v62, %v416_v22 }
 0x151   : > { %v730_v24 = vpop.permute.xlu1 %729 }
 0x152   : > { %v668_v23 = vpop.permute.xlu0 %667  ;;  %v934_v36 = vsel %vm923_vm7, %v917_v32, %v730_v24 }
 0x153   : > { %v918_v21 = vsel %vm906_vm6, %v901_v42, %v668_v23 }
 0x155   : > { %v542_v27 = vpop.permute.xlu1 %541 }
 0x156   : > { %v480_v28 = vpop.permute.xlu0 %479  ;;  %v885_v61 = vsel %vm872_vm4, %v868_v55, %v542_v27 }
 0x157   : > { %v869_v6 = vsel %vm855_vm3, %v852_v56, %v480_v28 }
 0x159   : > { %v794_v9 = vpop.permute.xlu1 %793 }
 0x15a   : > { %v732_v34 = vpop.permute.xlu0 %731  ;;  %v951_v38 = vsel %vm940_vm8, %v934_v36, %v794_v9 }
 0x15b   : > { %1546 = vmatprep.mubr.msk.f32.mxu1 %vm962_vm9, %v951_v38  ;;  %v935_v46 = vsel %vm923_vm7, %v918_v21, %v732_v34 }
 0x15d   : > { %v544_v13 = vpop.permute.xlu1 %543 }
 0x15e   : > { %v354_v39 = vpop.permute.xlu0 %353  ;;  %v886_v8 = vsel %vm872_vm4, %v869_v6, %v544_v13 }
 0x15f   : > { %v836_v18 = vsel %vm821_vm1, %v2097_v48, %v354_v39 }
 0x161   : > { %v796_v33 = vpop.permute.xlu1 %795 }
 0x162   : > { %v606_v47 = vpop.permute.xlu0 %605  ;;  %v952_v43 = vsel %vm940_vm8, %v935_v46, %v796_v33 }
 0x163   : > { %1547 = vmatmul.mubr.msk.f32.gmra.mrb[2].mxu1 %vm962_vm9, %v952_v43  ;;  %v902_v0 = vsel %vm889_vm5, %v885_v61, %v606_v47 }
 0x165   : > { %v418_v45 = vpop.permute.xlu1 %417 }
 0x166   : > { %v356_v49 = vpop.permute.xlu0 %355  ;;  %v853_v24 = vsel %vm838_vm2, %v836_v18, %v418_v45 }
 0x167   : > { %v837_v22 = vsel %vm821_vm1, %v2123_v63, %v356_v49 }
 0x169   : > { %v670_v17 = vpop.permute.xlu1 %669 }
 0x16a   : > { %v608_v52 = vpop.permute.xlu0 %607  ;;  %v919_v3 = vsel %vm906_vm6, %v902_v0, %v670_v17 }
 0x16b   : > { %v903_v10 = vsel %vm889_vm5, %v886_v8, %v608_v52 }
 0x16d   : > { %v482_v35 = vpop.permute.xlu1 %481 }
 0x16e   : > { %v420_v41 = vpop.permute.xlu0 %419  ;;  %v870_v4 = vsel %vm855_vm3, %v853_v24, %v482_v35 }
 0x16f   : > { %v854_v23 = vsel %vm838_vm2, %v837_v22, %v420_v41 }
 0x171   : > { %v734_v44 = vpop.permute.xlu1 %733 }
 0x172   : > { %v672_v50 = vpop.permute.xlu0 %671  ;;  %v936_v29 = vsel %vm923_vm7, %v919_v3, %v734_v44 }
 0x173   : > { %v920_v11 = vsel %vm906_vm6, %v903_v10, %v672_v50 }
 0x175   : > { %v546_v57 = vpop.permute.xlu1 %545 }
 0x176   : > { %v484_v60 = vpop.permute.xlu0 %483  ;;  %v887_v28 = vsel %vm872_vm4, %v870_v4, %v546_v57 }
 0x177   : > { %v871_v26 = vsel %vm855_vm3, %v854_v23, %v484_v60 }
 0x179   : > { %v798_v5 = vpop.permute.xlu1 %797 }
 0x17a   : > { %v736_v58 = vpop.permute.xlu0 %735  ;;  %v953_v2 = vsel %vm940_vm8, %v936_v29, %v798_v5 }
 0x17b   : > { %1549 = vmatprep.mubr.msk.f32.mxu1 %vm962_vm9, %v953_v2  ;;  %v937_v31 = vsel %vm923_vm7, %v920_v11, %v736_v58 }
 0x17d   : > { %v610_v7 = vpop.permute.xlu1 %609 }
 0x17e   : > { %v548_v1 = vpop.permute.xlu0 %547  ;;  %v904_v30 = vsel %vm889_vm5, %v887_v28, %v610_v7 }
 0x17f   : > { %v888_v19 = vsel %vm872_vm4, %v871_v26, %v548_v1 }
 0x181   : > { %v612_v59 = vpop.permute.xlu1 %611 }
 0x182   : > { %v800_v14 = vpop.permute.xlu0 %799  ;;  %v905_v48 = vsel %vm889_vm5, %v888_v19, %v612_v59 }
 0x183   : > { %v954_v16 = vsel %vm940_vm8, %v937_v31, %v800_v14 }
 0x184   : > { %1550 = vmatmul.mubr.msk.f32.gmra.mrb[4].mxu1 %vm962_vm9, %v954_v16 }
 0x185   : > { %v676_v51 = vpop.permute.xlu1 %675 }
 0x186   : > { %v674_v15 = vpop.permute.xlu0 %673  ;;  %v922_v63 = vsel %vm906_vm6, %v905_v48, %v676_v51 }
 0x187   : > { %v921_v32 = vsel %vm906_vm6, %v904_v30, %v674_v15 }
 0x189   : > { %v740_v12 = vpop.permute.xlu1 %739 }
 0x18a   : > { %v738_v27 = vpop.permute.xlu0 %737  ;;  %v939_v36 = vsel %vm923_vm7, %v922_v63, %v740_v12 }
 0x18b   : > { %v938_v9 = vsel %vm923_vm7, %v921_v32, %v738_v27 }
 0x18d   : > { %v804_v34 = vpop.permute.xlu1 %803 }
 0x18e   : > { %v802_v38 = vpop.permute.xlu0 %801  ;;  %v956_v37 = vsel %vm940_vm8, %v939_v36, %v804_v34 }
 0x18f   : > { %v955_v20 = vsel %vm940_vm8, %v938_v9, %v802_v38 }
 0x190   : > { %1552 = vmatprep.mubr.msk.f32.mxu1 %vm962_vm9, %v955_v20 }
 0x191   : > { %1553 = vmatmul.mubr.msk.f32.gmra.mrb[6].mxu1 %vm962_vm9, %v956_v37 }
 0x196   : > { %v1533_v25 = vpop.f32.mrb[0].mxu0 }
 0x197   : > { %v1161_v13 = vsel %vm838_vm2, %v1533_v25, 0.0  ;;  %v1081_v39 = vpop.f32.mrb[1].mxu0 }
 0x198   : > { %v1160_v40 = vsel %vm838_vm2, %v1081_v39, 0.0 }
 0x199   : > { %v1162_v42 = vadd.f32 %v1161_v13, %v1160_v40 }
 0x1b6   : > { %v1536_v21 = vpop.f32.mrb[2].mxu0 }
 0x1b7   : > { %v1091_v46 = vpop.f32.mrb[3].mxu0  ;;  %v1165_v43 = vsel %vm838_vm2, %v1536_v21, 0.0 }
 0x1b8   : > { %v1163_v33 = vsel %vm838_vm2, %v1091_v46, 0.0 }
 0x1b9   : > { %v1164_v47 = vadd.f32 %v1163_v33, %v1162_v42 }
 0x1bb   : > { %v1166_v45 = vadd.f32 %v1165_v43, %v1164_v47 }
 0x1d6   : > { %v1539_v49 = vpop.f32.mrb[4].mxu0 }
 0x1d7   : > { %v1101_v17 = vpop.f32.mrb[5].mxu0  ;;  %v1169_v41 = vsel %vm838_vm2, %v1539_v49, 0.0 }
 0x1d8   : > { %v1167_v52 = vsel %vm838_vm2, %v1101_v17, 0.0 }
 0x1d9   : > { %v1168_v35 = vadd.f32 %v1167_v52, %v1166_v45 }
 0x1db   : > { %v1170_v44 = vadd.f32 %v1169_v41, %v1168_v35 }
 0x1f6   : > { %v1542_v50 = vpop.f32.mrb[6].mxu0 }
 0x1f7   : > { %v1111_v54 = vpop.f32.mrb[7].mxu0  ;;  %v1173_v57 = vsel %vm838_vm2, %v1542_v50, 0.0 }
 0x1f8   : > { %v1171_v53 = vsel %vm838_vm2, %v1111_v54, 0.0 }
 0x1f9   : > { %v1172_v55 = vadd.f32 %v1171_v53, %v1170_v44 }
 0x1fb   : > { %v1174_v60 = vadd.f32 %v1173_v57, %v1172_v55 }
 0x216   : > { %v1545_v61 = vpop.f32.mrb[0].mxu1 }
 0x217   : > { %v1121_v0 = vpop.f32.mrb[1].mxu1  ;;  %v1177_v5 = vsel %vm838_vm2, %v1545_v61, 0.0 }
 0x218   : > { %v1175_v3 = vsel %vm838_vm2, %v1121_v0, 0.0 }
 0x219   : > { %v1176_v29 = vadd.f32 %v1175_v3, %v1174_v60 }
 0x21b   : > { %v1178_v58 = vadd.f32 %v1177_v5, %v1176_v29 }
 0x236   : > { %v1548_v2 = vpop.f32.mrb[2].mxu1 }
 0x237   : > { %v1131_v62 = vpop.f32.mrb[3].mxu1  ;;  %v1181_v7 = vsel %vm838_vm2, %v1548_v2, 0.0 }
 0x238   : > { %v1179_v56 = vsel %vm838_vm2, %v1131_v62, 0.0 }
 0x239   : > { %v1180_v6 = vadd.f32 %v1179_v56, %v1178_v58 }
 0x23b   : > { %v1182_v1 = vadd.f32 %v1181_v7, %v1180_v6 }
 0x257   : > { %v1551_v8 = vpop.f32.mrb[4].mxu1 }
 0x258   : > { %v1141_v10 = vpop.f32.mrb[5].mxu1  ;;  %v1185_v59 = vsel %vm838_vm2, %v1551_v8, 0.0 }
 0x259   : > { %v1183_v11 = vsel %vm838_vm2, %v1141_v10, 0.0 }
 0x25a   : > { %v1184_v31 = vadd.f32 %v1183_v11, %v1182_v1 }
 0x25c   : > { %v1186_v14 = vadd.f32 %v1185_v59, %v1184_v31 }
 0x264   : > { %v1554_v16 = vpop.f32.mrb[6].mxu1 }
 0x265   : > { %v1151_v51 = vpop.f32.mrb[7].mxu1  ;;  %v1189_v22 = vsel %vm838_vm2, %v1554_v16, 0.0 }
 0x266   : > { %v1187_v15 = vsel %vm838_vm2, %v1151_v51, 0.0 }
 0x267   : > { %v1188_v18 = vadd.f32 %v1187_v15, %v1186_v14 }
 0x269   : > { %v1190_v24 = vadd.f32 %v1189_v22, %v1188_v18 }
 0x26b   : > { %v1191_v23 = vrot.slane %v1190_v24, 4 }
 0x26d   : > { %v1192_v4 = vadd.f32 %v1191_v23, %v1190_v24 }
 0x26f   : > { %v1193_v26 = vrot.slane %v1192_v4, 2 }
 0x271   : > { %v1194_v12 = vadd.f32 %v1193_v26, %v1192_v4 }
 0x273   : > { %v1195_v27 = vrot.slane %v1194_v12, 1 }
 0x275   : > { %v2354_v28 = vadd.f32 %v1195_v27, %v1194_v12 }
 0x277   : > { %v1197_v19 = vmul.f32 0.0078125, %v2354_v28 }
 0x279   : > { %v1198_v30 = vsub.f32 %v1081_v39, %v1197_v19  ;;  %v1199_v48 = vsub.f32 %v1533_v25, %v1197_v19  ;;  %v1200_v63 = vsub.f32 %v1091_v46, %v1197_v19  ;;  %v1201_v32 = vsub.f32 %v1536_v21, %v1197_v19 }
 0x27a   : > { %v1202_v36 = vsub.f32 %v1101_v17, %v1197_v19  ;;  %v1203_v9 = vsub.f32 %v1539_v49, %v1197_v19  ;;  %v1204_v34 = vsub.f32 %v1111_v54, %v1197_v19  ;;  %v1205_v38 = vsub.f32 %v1542_v50, %v1197_v19 }
 0x27b   : > { %v1206_v37 = vsub.f32 %v1121_v0, %v1197_v19  ;;  %v1207_v20 = vsub.f32 %v1545_v61, %v1197_v19  ;;  %v1208_v13 = vsub.f32 %v1131_v62, %v1197_v19  ;;  %v1209_v40 = vsub.f32 %v1548_v2, %v1197_v19 }
 0x27c   : > { %v1210_v42 = vsub.f32 %v1141_v10, %v1197_v19  ;;  %v1211_v33 = vsub.f32 %v1551_v8, %v1197_v19  ;;  %v1212_v47 = vsub.f32 %v1151_v51, %v1197_v19  ;;  %v1213_v43 = vsub.f32 %v1554_v16, %v1197_v19 }
 0x27d   : > { %v1214_v45 = vmul.f32 %v1198_v30, %v1198_v30  ;;  %v1215_v52 = vmul.f32 %v1199_v48, %v1199_v48  ;;  %v1216_v35 = vmul.f32 %v1200_v63, %v1200_v63  ;;  %v1217_v41 = vmul.f32 %v1201_v32, %v1201_v32 }
 0x27e   : > { %v1218_v46 = vmul.f32 %v1202_v36, %v1202_v36  ;;  %v1219_v44 = vmul.f32 %v1203_v9, %v1203_v9  ;;  %v1220_v53 = vmul.f32 %v1204_v34, %v1204_v34  ;;  %v1221_v60 = vmul.f32 %v1205_v38, %v1205_v38 }
 0x27f   : > { %v1230_v25 = vsel %vm838_vm2, %v1214_v45, 0.0  ;;  %v1231_v39 = vsel %vm838_vm2, %v1215_v52, 0.0  ;;  %v1233_v49 = vsel %vm838_vm2, %v1216_v35, 0.0  ;;  %v1235_v50 = vsel %vm838_vm2, %v1217_v41, 0.0 }
 0x280   : > { %v1232_v21 = vadd.f32 %v1231_v39, %v1230_v25  ;;  %v1237_v55 = vsel %vm838_vm2, %v1218_v46, 0.0  ;;  %v1239_v61 = vsel %vm838_vm2, %v1219_v44, 0.0  ;;  %v1222_v3 = vmul.f32 %v1206_v37, %v1206_v37 }
 0x281   : > { %v1241_v29 = vsel %vm838_vm2, %v1220_v53, 0.0  ;;  %v1223_v58 = vmul.f32 %v1207_v20, %v1207_v20  ;;  %v1243_v2 = vsel %vm838_vm2, %v1221_v60, 0.0  ;;  %v1224_v56 = vmul.f32 %v1208_v13, %v1208_v13 }
 0x282   : > { %v1234_v17 = vadd.f32 %v1233_v49, %v1232_v21  ;;  %v1245_v6 = vsel %vm838_vm2, %v1222_v3, 0.0  ;;  %v1225_v1 = vmul.f32 %v1209_v40, %v1209_v40  ;;  %v1226_v11 = vmul.f32 %v1210_v42, %v1210_v42 }
 0x283   : > { %v1247_v8 = vsel %vm838_vm2, %v1223_v58, 0.0  ;;  %v1249_v31 = vsel %vm838_vm2, %v1224_v56, 0.0  ;;  %v1227_v14 = vmul.f32 %v1211_v33, %v1211_v33  ;;  %v1228_v15 = vmul.f32 %v1212_v47, %v1212_v47 }
 0x284   : > { %v1236_v54 = vadd.f32 %v1235_v50, %v1234_v17  ;;  %v1251_v16 = vsel %vm838_vm2, %v1225_v1, 0.0  ;;  %v1253_v18 = vsel %vm838_vm2, %v1226_v11, 0.0  ;;  %v1229_v24 = vmul.f32 %v1213_v43, %v1213_v43 }
 0x285   : > { %v1255_v23 = vsel %vm838_vm2, %v1227_v14, 0.0  ;;  %v1257_v26 = vsel %vm838_vm2, %v1228_v15, 0.0 }
 0x286   : > { %v1238_v57 = vadd.f32 %v1237_v55, %v1236_v54  ;;  %v1259_v27 = vsel %vm838_vm2, %v1229_v24, 0.0 }
 0x288   : > { %v1240_v0 = vadd.f32 %v1239_v61, %v1238_v57 }
 0x28a   : > { %v1242_v5 = vadd.f32 %v1241_v29, %v1240_v0 }
 0x28c   : > { %v1244_v62 = vadd.f32 %v1243_v2, %v1242_v5 }
 0x28e   : > { %v1246_v7 = vadd.f32 %v1245_v6, %v1244_v62 }
 0x290   : > { %v1248_v10 = vadd.f32 %v1247_v8, %v1246_v7 }
 0x292   : > { %v1250_v59 = vadd.f32 %v1249_v31, %v1248_v10 }
 0x294   : > { %v1252_v51 = vadd.f32 %v1251_v16, %v1250_v59 }
 0x296   : > { %v1254_v22 = vadd.f32 %v1253_v18, %v1252_v51 }
 0x298   : > { %v1256_v4 = vadd.f32 %v1255_v23, %v1254_v22 }
 0x29a   : > { %v1258_v12 = vadd.f32 %v1257_v26, %v1256_v4 }
 0x29c   : > { %v1260_v19 = vadd.f32 %v1259_v27, %v1258_v12 }
 0x29e   : > { %v1261_v30 = vrot.slane %v1260_v19, 4 }
 0x2a0   : > { %v1262_v48 = vadd.f32 %v1261_v30, %v1260_v19 }
 0x2a2   : > { %v1263_v63 = vrot.slane %v1262_v48, 2 }
 0x2a4   : > { %v1264_v32 = vadd.f32 %v1263_v63, %v1262_v48 }
 0x2a6   : > { %v1265_v36 = vrot.slane %v1264_v32, 1 }
 0x2a8   : > { %v1266_v9 = vadd.f32 %v1265_v36, %v1264_v32 }
 0x2aa   : > { %v1268_v34 = vsel %vm1267_vm10, %v2354_v28, %v1266_v9 }
 0x2ab   : > { %1270 = vst.msk [vmem:[%s150_s21] sm:$0x3] %vm1269_vm11, %v1268_v34 }
 0x2ac   : > { %1662 = shalt.err (!%p1659_p6)
}
 0x2ad   : > { %s1663_s26 = scalar_lea.hbm %s2379_s4, 32  ;;  %s1667_s7 = scalar_lea.hbm %s2435_s2, 128 }
 0x2ae   : > { %p1664_p7 = scmp.ne.s32.totalorder %s2379_s4, %s1663_s26  ;;  %p1668_p11 = scmp.lt.u32.totalorder %s2379_s4, %s2435_s2 }
 0x2af   : > { %p1669_p12 = scmp.lt.u32.totalorder %s1667_s7, %s1663_s26  ;;  %p1671_p0 = scmp.lt.u32.totalorder %s1663_s26, %s2379_s4 }
 0x2b0   : > { %p1665_p9 = pnand %p1664_p7, %p1820_p3 }
 0x2b1   : > { %p1670_p13 = por %p1669_p12, %p1668_p11 }
 0x2b2   : > { %p1666_p10 = pneg %p1665_p9 }
 0x2b3   : > { %p1672_p1 = por %p1671_p0, %p1670_p13 }
 0x2b5   : > { %p1673_p2 = pnand %p1672_p1, %p1666_p10 }
 0x2b7   : > { %1676 = shalt.err (!%p1673_p2)
}
 0x2b8   : > { %1570 = dma.vmem_to_hbm [thread:$0]  (%p1820_p3), %s2381_s29, 32, %s2379_s4, %s1272_s12  }
 0x2b9 PF: > { %p1576_p4 = scmp.ge.s32.totalorder %s1743_s16, 2  ;;  %s1299_s18 = sand.u32 1, %s1715_s9  }
 0x2ba   : > { %s1300_s21 = scalar_lea.sflag [#allocation3], %s1299_s18 }
 0x2bb   : > { %p1573_p5 = pnand %p1576_p4, %p1829_p8 }
 0x2bd   : > { %1710 = dma.done.wait (!%p1573_p5), %s1300_s21, 32  }
 0x2be   : > { %1712 = vsyncadd (!%p1573_p5), %s1300_s21, 4294967264  ;;  %s15_s16 = sadd.s32 1, %s1743_s16   ;;  %s2438_s9 = smov %s1719_s10 }
 0x2bf   : > { %p12_p6 = scmp.ge.s32.totalorder %s15_s16, 6   ;;  %s2439_s10 = smov %s1723_s11 }
 0x2c0   : > { %s2440_s11 = smov %s1838_s27  ;;  %s2441_s12 = smov %s1735_s14 }
 0x2c1   : > { %s2442_s13 = smov %s1739_s15  ;;  %s2443_s14 = smov %s2446_s19 }
 0x2c2   : > { %s2444_s15 = smov %s2450_s20  ;;  %14 = sbr.rel (!%p12_p6) target bundleno = 5 (0x5), region = 66 }
 0x2c9   :  { %1305 = vsyncpa [#allocation3], 1 }
 0x2ca   :  { %1307 = vsyncpa [#allocation3 + $0x1], 1 }

</bundles_post_ra>
